<compile_context>
chip_gen: v6e
topology: v6e:2x2x1
jax: 0.10.0
libtpu: 0.0.40
codegen_flags: <defaults>
</compile_context>

<pallas_src>
import itertools

import numpy as np
import jax
import jax.numpy as jnp
from jax.experimental import pallas as pl
from jax.experimental.pallas import tpu as pltpu


def _make_dct_params():
    """Deterministic parameter init, identical to the PyTorch __init__."""
    tensor = np.zeros((8, 8, 8, 8), dtype=np.float32)
    for x, y, u, v in itertools.product(range(8), repeat=4):
        tensor[x, y, u, v] = (
            np.cos((2 * x + 1) * u * np.pi / 16)
            * np.cos((2 * y + 1) * v * np.pi / 16)
        )
    alpha = np.array([1.0 / np.sqrt(2)] + [1] * 7)
    scale = (np.outer(alpha, alpha) * 0.25).astype(np.float32)
    return jnp.asarray(tensor), jnp.asarray(scale)


def _fold_params(tensor, scale):
    """Fold (-128) and scale into the DCT matrix; pack two blocks per 128-lane row."""
    t_flat = tensor.reshape(64, 64)                       # (x*8+y, u*8+v)
    scale_flat = scale.reshape(1, 64)                     # per output column (u*8+v)
    t_s = t_flat * scale_flat                             # (64, 64) scaled basis
    bias64 = 128.0 * jnp.sum(t_s, axis=0, keepdims=True)  # (1, 64)

    # Block-diagonal packing: row = [block_a(64) | block_b(64)] -> 128-lane output.
    t_packed = jnp.zeros((128, 128), jnp.float32)
    t_packed = t_packed.at[:64, :64].set(t_s)
    t_packed = t_packed.at[64:, 64:].set(t_s)
    bias_packed = jnp.concatenate([bias64, bias64], axis=1)  # (1, 128)
    return t_packed, bias_packed


def _dct_kernel(img_ref, t_ref, bias_ref, out_ref):
    # img_ref:  (TM, 128) two packed 8x8 blocks per row, raw pixel values
    # t_ref:    (128, 128) blkdiag(T*scale, T*scale)   (VMEM-resident across grid)
    # bias_ref: (1, 128)   128 * column-sums of T*scale
    # out_ref:  (TM, 128)
    # Single expression so the matmul result feeds the subtract without an extra
    # named TM x 128 temp (intermediate still budgeted in the VMEM math).
    out_ref[...] = (
        jnp.dot(img_ref[...], t_ref[...], preferred_element_type=jnp.float32)
        - bias_ref[...]
    )


def _chip_tile_config():
    """(TM_target, vmem_limit_bytes) per chip generation.

    v7x: faster HBM (3.2 TB/s) needs bigger tiles; 64 MiB physical VMEM -> 48 MiB scoped
         budget (TM=8192: 3x4 MiB in + 3x4 MiB out + ~4 MiB dot temp ~= 28 MiB).
    v5e/v6e/unknown: TM=4096 reaches ~90% of HBM roofline; 32 MiB scoped limit covers
         v5e's 16 MiB default (usage ~14 MiB with triple buffering) and is trivially
         within 128 MiB physical.
    """
    kind = ""
    try:
        kind = jax.devices()[0].device_kind.lower()
    except Exception:
        pass
    if "v7" in kind:
        return 8192, 48 * 1024 * 1024
    return 4096, 32 * 1024 * 1024


def dct_8x8(image, tensor, scale):
    """image: (batch, 8, 8) float32 -> (batch, 8, 8) float32."""
    batch = image.shape[0]
    if batch == 0:
        return jnp.zeros(image.shape, jnp.float32)

    t_packed, bias_packed = _fold_params(tensor, scale)

    img_flat = image.reshape(batch, 64).astype(jnp.float32)

    # Pack two 8x8 blocks per 128-lane row. Only pad when the batch is odd (a single
    # extra 64-float row). No padding to a multiple of TM: the partial trailing grid
    # block is handled by Pallas (rows are independent; OOB rows are masked on store).
    batch_even = batch + (batch & 1)
    if batch_even != batch:
        img_flat = jnp.pad(img_flat, ((0, 1), (0, 0)))
    m2 = batch_even // 2
    img_packed = img_flat.reshape(m2, 128)

    tm_target, vmem_limit = _chip_tile_config()

    # Row tile: big enough to amortize the ~0.35 us/step pipeline overhead, but never
    # fewer than 2 grid steps (keeps both v7x TensorCores busy via "parallel" sharding).
    if m2 <= 8:
        tm = 8
    else:
        half = (m2 + 1) // 2
        tm = min(tm_target, ((half + 7) // 8) * 8)
    grid_steps = -(-m2 // tm)
    grid = (grid_steps,)

    # Triple-buffer the streaming blocks when the grid is long enough to benefit
    # (per-step compute is much shorter than the per-step DMA -> pipeline is DMA-exposed).
    stream_kwargs = {}
    if grid_steps >= 3:
        stream_kwargs["pipeline_mode"] = pl.Buffered(3)

    img_spec = pl.BlockSpec((tm, 128), lambda i: (i, 0), **stream_kwargs)
    out_spec = pl.BlockSpec((tm, 128), lambda i: (i, 0), **stream_kwargs)

    rows_total = grid_steps * tm
    cost = pl.CostEstimate(
        flops=2 * rows_total * 128 * 128,
        transcendentals=0,
        bytes_accessed=2 * m2 * 128 * 4 + 128 * 128 * 4 + 128 * 4,
    )

    out_packed = pl.pallas_call(
        _dct_kernel,
        out_shape=jax.ShapeDtypeStruct((m2, 128), jnp.float32),
        grid_spec=pl.GridSpec(
            grid=grid,
            in_specs=[
                img_spec,
                pl.BlockSpec((128, 128), lambda i: (0, 0)),  # weight stays resident
                pl.BlockSpec((1, 128), lambda i: (0, 0)),    # bias stays resident
            ],
            out_specs=out_spec,
        ),
        compiler_params=pltpu.CompilerParams(
            dimension_semantics=("parallel",),   # only meaningful on v7x megacore
            vmem_limit_bytes=vmem_limit,
        ),
        cost_estimate=cost,
    )(img_packed, t_packed, bias_packed)

    # Unpack two blocks per row back to (batch, 8, 8); drop the odd-batch pad row only.
    out_flat = out_packed.reshape(batch_even, 64)
    if batch_even != batch:
        out_flat = out_flat[:batch]
    return out_flat.reshape(image.shape)


def dct_8x8_ref(image, tensor, scale):
    """Plain-JAX reference mirroring the PyTorch forward."""
    x = image - 128.0
    res = jnp.tensordot(x, tensor, axes=2)  # contract (h, w) with (x, y)
    return scale * res


if __name__ == "__main__":
    key = jax.random.PRNGKey(0)
    tensor, scale = _make_dct_params()

    # Small, deterministic cases: even batch with a partial trailing grid block (30),
    # and an odd batch exercising the single-row packing pad (7).
    for batch in (30, 7):
        key, sub = jax.random.split(key)
        x = jax.random.uniform(
            sub, (batch, 8, 8), dtype=jnp.float32, minval=0.0, maxval=255.0
        )
        out = jax.block_until_ready(dct_8x8(x, tensor, scale))
        ref = dct_8x8_ref(x, tensor, scale)
        np.testing.assert_allclose(
            np.asarray(out), np.asarray(ref), rtol=1e-5, atol=1e-3
        )

    print("KERNEL_OK")
</pallas_src>

<mosaic_0001>
module attributes {stable_mosaic.version = 11 : i64} {
  func.func @_dct_kernel(%arg0: i32, %arg1: memref<8x128xf32, #tpu.memory_space<vmem>>, %arg2: memref<128x128xf32, #tpu.memory_space<vmem>>, %arg3: memref<1x128xf32, #tpu.memory_space<vmem>>, %arg4: memref<8x128xf32, #tpu.memory_space<vmem>>) attributes {dimension_semantics = [#tpu.dimension_semantics<parallel>], iteration_bounds = array<i64: 2>, scalar_prefetch = 0 : i64, scratch_operands = 0 : i64, tpu.core_type = #tpu.core_type<tc>, window_params = [{transform_indices = @transform_0, window_bounds = array<i64: 8, 128>}, {pipeline_mode = #tpu.pipeline_mode<synchronous>, transform_indices = @transform_1, window_bounds = array<i64: 128, 128>}, {pipeline_mode = #tpu.pipeline_mode<synchronous>, transform_indices = @transform_2, window_bounds = array<i64: 1, 128>}, {transform_indices = @transform_3, window_bounds = array<i64: 8, 128>}]} {
    %c0 = arith.constant 0 : index
    %c0_0 = arith.constant 0 : index
    %0 = vector.load %arg1[%c0, %c0_0] : memref<8x128xf32, #tpu.memory_space<vmem>>, vector<8x128xf32>
    %c0_1 = arith.constant 0 : index
    %c0_2 = arith.constant 0 : index
    %1 = vector.load %arg2[%c0_1, %c0_2] : memref<128x128xf32, #tpu.memory_space<vmem>>, vector<128x128xf32>
    %cst = arith.constant dense<0.000000e+00> : vector<8x128xf32>
    %2 = tpu.matmul %0, %1, %cst {dimension_numbers = #tpu.dot_dimension_numbers<[1], [0], [0], [1], [0, 0, 1, 1], [], []>} : vector<8x128xf32>, vector<128x128xf32>, vector<8x128xf32> -> vector<8x128xf32>
    %c0_3 = arith.constant 0 : index
    %c0_4 = arith.constant 0 : index
    %3 = vector.load %arg3[%c0_3, %c0_4] : memref<1x128xf32, #tpu.memory_space<vmem>>, vector<1x128xf32>
    %4 = vector.broadcast %3 : vector<1x128xf32> to vector<8x128xf32>
    %5 = arith.subf %2, %4 : vector<8x128xf32>
    %c0_5 = arith.constant 0 : index
    %c0_6 = arith.constant 0 : index
    %6 = vector.load %arg4[%c0_5, %c0_6] : memref<8x128xf32, #tpu.memory_space<vmem>>, vector<8x128xf32>
    tpu.vector_store %arg4[%c0_5, %c0_6], %5 {strides = array<i32>} : memref<8x128xf32, #tpu.memory_space<vmem>>, vector<8x128xf32>,
    return
  }
  func.func @transform_0(%arg0: i32) -> (i32, i32) {
    %c0_i32 = arith.constant 0 : i32
    %c0_i32_0 = arith.constant 0 : i32
    return %arg0, %c0_i32 : i32, i32
  }
  func.func @transform_1(%arg0: i32) -> (i32, i32) {
    %c0_i32 = arith.constant 0 : i32
    %c0_i32_0 = arith.constant 0 : i32
    %c0_i32_1 = arith.constant 0 : i32
    return %c0_i32, %c0_i32_0 : i32, i32
  }
  func.func @transform_2(%arg0: i32) -> (i32, i32) {
    %c0_i32 = arith.constant 0 : i32
    %c0_i32_0 = arith.constant 0 : i32
    %c0_i32_1 = arith.constant 0 : i32
    return %c0_i32, %c0_i32_0 : i32, i32
  }
  func.func @transform_3(%arg0: i32) -> (i32, i32) {
    %c0_i32 = arith.constant 0 : i32
    %c0_i32_0 = arith.constant 0 : i32
    return %arg0, %c0_i32 : i32, i32
  }
}

</mosaic_0001>

<bundles_post_ra>
// kernel: tpu_custom_call.1
= control target key start
LH: loop header
LB: loop body
LE: loop exit
PB: predicated region body
PF: predicated region fallthrough
CT: control target
= control target key end

     0   :  { %8 = vsyncpa [#allocation3], 0  ;;  %s840_s0 = inlined_call_operand.hbm [shape: f32[15,128], index: 0, kind: input, shape index: {}]   ;;  %s841_s1 = inlined_call_operand.hbm [shape: f32[128,128], index: 1, kind: input, shape index: {}]   ;;  %s842_s2 = inlined_call_operand.vmem [shape: f32[1,128], index: 2, kind: input, shape index: {}]   ;;  %s843_s3 = inlined_call_operand.hbm [shape: f32[15,128], index: 3, kind: output, shape index: {}]  }
   0x1   :  { %10 = vsyncpa [#allocation3 + $0x1], 0 }
   0x2   :  { %11 = vsyncpa [#allocation6], 0 }
   0x3   :  { %12 = vsyncpa [#allocation4], 0 }
   0x4   :  { %14 = vsyncpa [#allocation4 + $0x1], 0  ;;  %s670_s12 = smov 0   ;;  %s672_s13 = smov 0  }
   0x5   :  { %s674_s14 = smov 0   ;;  %s676_s15 = smov 0  }
   0x6 LB: > { %s691_s16 = sadd.s32 4294967295, %s641_s15   ;;  %s391_s17 = sadd.s32 4294967294, %s641_s15   ;;  %s641_s15 = sphi %s676_s15, %s865_s15   ;;  %s637_s14 = sphi %s674_s14, %s864_s14   ;;  %s633_s13 = sphi %s672_s13, %s863_s13   ;;  %s629_s12 = sphi %s670_s12, %s862_s12  }
   0x7   : > { %p40_p0 = scmp.ne.s32.totalorder %s633_s13, %s629_s12  ;;  %p844_p1 = scmp.eq.s32.totalorder %s691_s16, 0 }
   0x8   : > { %p112_p3 = scmp.eq.s32.totalorder %s391_s17, 1  ;;  %p392_p5 = scmp.ge.s32.totalorder %s641_s15, 1 }
   0x9   : > { %p700_p4 = por %p844_p1, %p40_p0  ;;  %p119_p7 = scmp.lt.s32.totalorder %s641_s15, 3 }
   0xa   : > { %p705_p6 = por %p112_p3, %p40_p0  ;;  %s643_s21 = smov [#allocation5]  }
   0xb   : > { %s848_s18 = scalar_select %p700_p4, 1, 0 }
   0xc   : > { %s849_s19 = scalar_select %p705_p6, 1, 0 }
   0xd   : > { %p710_p8 = pnand %p392_p5, %p119_p7  ;;  %s131_s22 = sshll.u32 %s643_s21, 4  ;;  %s132_s22 = int_to_ptr.vmem [resolvable:$true] %s131_s22 }
   0xe   : > { %s724_s24 = sadd.s32 1, %s641_s15   ;;  %s27_s25 = sadd.s32 1, %s637_s14 }
   0xf   : > { %s850_s20 = scalar_select %p710_p8, 1, 0 }
  0x10   : > { %p466_p9 = pneg %p710_p8  ;;  %s24_s26 = ssub.s32 %s641_s15, %s724_s24 }
  0x11   : > { %s530_s27 = scalar_lea.vmem %s132_s22, 2048  ;;  %p538_p5 = scmp.lt.s32.totalorder %s132_s22, %s132_s22 }
  0x12   : > { %p719_p11 = pnand %p466_p9, %p844_p1  ;;  %p531_p13 = scmp.ne.s32.totalorder %s132_s22, %s530_s27 }
  0x13   : > { %p539_p7 = scmp.lt.s32.totalorder %s530_s27, %s530_s27 }
  0x14   : > { %p521_p12 = pneg %p719_p11 }
  0x15   : > { %p540_p10 = por %p539_p7, %p538_p5 }
  0x16   : > { %p533_p0 = pnand %p531_p13, %p521_p12 }
  0x18   : > { %p534_p3 = pneg %p533_p0 }
  0x1a   : > { %p541_p2 = pnand %p540_p10, %p534_p3 }
  0x1c   : > { %544 = shalt.err (!%p541_p2)
}
  0x1d   : > { %s644_s28 = smov 128   ;;  %s645_s29 = smov 8  }
  0x1e   : > { %469 = dma.hbm_to_vmem [thread:$0]  (!%p719_p11), %s841_s1, 2048, %s132_s22, [#allocation6], %s644_s28, %s644_s28, %s645_s29  }
  0x1f   : > { %p25_p9 = scmp.eq.s32.totalorder %s24_s26, 0  ;;  %p34_p12 = scmp.ne.s32.totalorder %s637_s14, %s633_s13 }
  0x20   : > { %p35_p10 = scmp.eq.s32.totalorder %s641_s15, 0  ;;  %p479_p2 = scmp.lt.s32.totalorder %s641_s15, 2 }
  0x21   : > { %s741_s5 = scalar_select %p25_p9, %s637_s14, %s27_s25  }
  0x22   : > { %p36_p13 = por %p35_p10, %p34_p12  ;;  %p852_p0 = scmp.eq.s32.totalorder %s691_s16, 1 }
  0x23   : > { %s148_s7 = sand.u32 1, %s637_s14   ;;  %s396_s8 = sshll.u32 %s641_s15, 7 }
  0x24   : > { %p745_p3 = por %p852_p0, %p34_p12  ;;  %s395_s9 = sshll.u32 %s148_s7, 3 }
  0x25   : > { %s754_s17 = scalar_lea.hbm %s840_s0, %s396_s8  ;;  %s152_s21 = scalar_lea.vmem [#allocation2], %s395_s9 }
  0x26   : > { %s853_s6 = scalar_select %p745_p3, 1, 0 }
  0x27   : > { %s159_s22 = sshll.u32 %s152_s21, 4  ;;  %p756_p11 = pnand %p479_p2, %p36_p13  ;;  %s160_s22 = int_to_ptr.vmem [resolvable:$true] %s159_s22 }
  0x28   : > { %s149_s25 = scalar_lea.sflag [#allocation3], %s148_s7  ;;  %s545_s26 = scalar_lea.hbm %s754_s17, 128 }
  0x29   : > { %p546_p5 = scmp.ne.s32.totalorder %s754_s17, %s545_s26  ;;  %p547_p7 = pneg %p756_p11 }
  0x2a   : > { %s550_s29 = scalar_lea.hbm %s840_s0, 256  ;;  %p551_p10 = scmp.lt.s32.totalorder %s754_s17, %s840_s0 }
  0x2b   : > { %p548_p9 = pnand %p547_p7, %p546_p5  ;;  %p552_p2 = scmp.lt.s32.totalorder %s550_s29, %s545_s26 }
  0x2d   : > { %p549_p12 = pneg %p548_p9  ;;  %p553_p13 = por %p552_p2, %p551_p10 }
  0x2f   : > { %p554_p0 = pnand %p553_p13, %p549_p12 }
  0x31   : > { %557 = shalt.err (!%p554_p0)
}
  0x32   : > { %s558_s8 = scalar_lea.vmem %s160_s22, 128  ;;  %s646_s7 = smov [#allocation2]  }
  0x33   : > { %p559_p1 = scmp.ne.s32.totalorder %s160_s22, %s558_s8  ;;  %s563_s9 = sshll.u32 %s646_s7, 4  ;;  %s564_s9 = int_to_ptr.vmem [resolvable:$false] %s563_s9 }
  0x34   : > { %s565_s10 = scalar_lea.vmem %s564_s9, 256  ;;  %p566_p5 = scmp.lt.s32.totalorder %s160_s22, %s564_s9 }
  0x35   : > { %p561_p6 = pnand %p559_p1, %p547_p7  ;;  %p567_p9 = scmp.lt.s32.totalorder %s565_s10, %s558_s8 }
  0x37   : > { %p562_p3 = pneg %p561_p6  ;;  %p568_p4 = por %p567_p9, %p566_p5 }
  0x39   : > { %p569_p8 = pnand %p568_p4, %p562_p3 }
  0x3b   : > { %572 = shalt.err (!%p569_p8)
}
  0x3c   : > { %473 = dma.hbm_to_vmem [thread:$0]  (!%p756_p11), %s754_s17, 128, %s160_s22, %s149_s25  }
  0x3d   : > { %p855_p12 = scmp.ne.s32.totalorder %s850_s20, 0 }
  0x3e   : > { %s777_s11 = sand.u32 (!%p855_p12), 1, %s633_s13   ;;  %p856_p1 = scmp.ne.s32.totalorder (!%p855_p12), %s848_s18, 0 }
  0x3f   : > { %168 = sbr.rel (%p855_p12) target bundleno = 313 (0x139), region = 32  ;;  %s398_s21 = sshll.u32 (!%p855_p12), %s777_s11, 3 }
  0x40   : > { %s171_s26 = scalar_lea.sflag (!%p855_p12), [#allocation3], %s777_s11  ;;  %s783_s27 = scalar_lea.vmem (!%p855_p12), [#allocation2], %s398_s21 }
  0x44   : > { %616 = dma.done.wait (%p856_p1), %s171_s26, 128  }
  0x45   : > { %618 = vsyncadd (%p856_p1), %s171_s26, 4294967168  ;;  %p857_p4 = scmp.eq.s32.totalorder %s691_s16, 0 }
  0x47   : > { %620 = dma.done.wait (%p857_p4), [#allocation6], 2048   ;;  %p858_p6 = pmov %p857_p4 }
  0x48   : > { %v647_v0 = vmov 0.0   ;;  %vm648_vm0 = vmmov 0   ;;  %v217_v1 = vld [vmem:[#allocation5 + $0x78] sm:$0xff]  ;;  %v216_v2 = vld [vmem:[#allocation5 + $0x70] sm:$0xff]  ;;  %v215_v3 = vld [vmem:[#allocation5 + $0x68] sm:$0xff]  ;;  %s403_s17 = sshll.u32 %s691_s16, 7 }
  0x49   : > { %622 = vsyncadd (%p858_p6), [#allocation6], 4294965248  ;;  %423 = vmatprep.subr.mxu0 %v647_v0  ;;  %455 = vmatprep.mubr.msk.f32.mxu0 %vm648_vm0, %v647_v0  ;;  %v214_v4 = vld [vmem:[#allocation5 + $0x60] sm:$0xff]  ;;  %v213_v5 = vld [vmem:[#allocation5 + $0x58] sm:$0xff]  ;;  %s200_s22 = scalar_lea.vmem [#allocation7], %s398_s21  ;;  %s803_s29 = scalar_lea.hbm %s843_s3, %s403_s17 }
  0x4a   : > { %424 = vmatpush3.msra.mxu0 %v217_v1  ;;  %v212_v6 = vld [vmem:[#allocation5 + $0x50] sm:$0xff]  ;;  %v211_v7 = vld [vmem:[#allocation5 + $0x48] sm:$0xff]  ;;  %v210_v8 = vld [vmem:[#allocation5 + $0x40] sm:$0xff]  ;;  %s311_s23 = sshll.u32 %s200_s22, 4  ;;  %s298_s30 = scalar_lea.sflag [#allocation4], %s777_s11  ;;  %s312_s23 = int_to_ptr.vmem [resolvable:$true] %s311_s23 }
  0x4b   : > { %425 = vmatprep.subr.mxu0 %v647_v0  ;;  %v209_v9 = vld [vmem:[#allocation5 + $0x38] sm:$0xff]  ;;  %v208_v10 = vld [vmem:[#allocation5 + $0x30] sm:$0xff]  ;;  %v207_v11 = vld [vmem:[#allocation5 + $0x28] sm:$0xff]  ;;  %s573_s4 = scalar_lea.vmem %s312_s23, 128  ;;  %p859_p3 = scmp.ne.s32.totalorder %s853_s6, 0 }
  0x4c   : > { %426 = vmatpush3.msra.mxu0 %v216_v2  ;;  %v206_v12 = vld [vmem:[#allocation5 + $0x20] sm:$0xff]  ;;  %v205_v13 = vld [vmem:[#allocation5 + $0x18] sm:$0xff]  ;;  %v204_v14 = vld [vmem:[#allocation5 + $0x10] sm:$0xff]  ;;  %p574_p8 = scmp.ne.s32.totalorder %s312_s23, %s573_s4  ;;  %s649_s16 = smov [#allocation7]  }
  0x4d   : > { %427 = vmatprep.subr.mxu0 %v647_v0  ;;  %v203_v15 = vld [vmem:[#allocation5 + $0x8] sm:$0xff]  ;;  %v202_v16 = vld [vmem:[#allocation5] sm:$0xff]  ;;  %v201_v17 = vld [vmem:[%s783_s27] sm:$0xff]  ;;  %s577_s8 = sshll.u32 %s649_s16, 4  ;;  %s578_s8 = int_to_ptr.vmem [resolvable:$false] %s577_s8 }
  0x4e   : > { %428 = vmatpush3.msra.mxu0 %v215_v3  ;;  %v401_v18 = vld [vmem:[%s842_s2] ss:$0 sm:$0xff]  ;;  %p575_p11 = pnand %p574_p8, %p859_p3  ;;  %s579_s7 = scalar_lea.vmem %s578_s8, 256 }
  0x4f   : > { %429 = vmatprep.subr.mxu0 %v647_v0  ;;  %p580_p10 = scmp.lt.s32.totalorder %s312_s23, %s578_s8  ;;  %p581_p2 = scmp.lt.s32.totalorder %s579_s7, %s573_s4 }
  0x50   : > { %430 = vmatpush3.msra.mxu0 %v214_v4  ;;  %p576_p7 = pneg %p575_p11 }
  0x51   : > { %431 = vmatprep.subr.mxu0 %v647_v0  ;;  %p582_p13 = por %p581_p2, %p580_p10 }
  0x52   : > { %432 = vmatpush3.msra.mxu0 %v213_v5 }
  0x53   : > { %433 = vmatprep.subr.mxu0 %v647_v0  ;;  %p583_p0 = pnand %p582_p13, %p576_p7 }
  0x54   : > { %434 = vmatpush3.msra.mxu0 %v212_v6 }
  0x55   : > { %435 = vmatprep.subr.mxu0 %v647_v0 }
  0x56   : > { %436 = vmatpush3.msra.mxu0 %v211_v7 }
  0x57   : > { %437 = vmatprep.subr.mxu0 %v647_v0 }
  0x58   : > { %438 = vmatpush3.msra.mxu0 %v210_v8 }
  0x59   : > { %439 = vmatprep.subr.mxu0 %v647_v0 }
  0x5a   : > { %440 = vmatpush3.msra.mxu0 %v209_v9 }
  0x5b   : > { %441 = vmatprep.subr.mxu0 %v647_v0 }
  0x5c   : > { %442 = vmatpush3.msra.mxu0 %v208_v10 }
  0x5d   : > { %443 = vmatprep.subr.mxu0 %v647_v0 }
  0x5e   : > { %444 = vmatpush3.msra.mxu0 %v207_v11 }
  0x5f   : > { %445 = vmatprep.subr.mxu0 %v647_v0 }
  0x60   : > { %446 = vmatpush3.msra.mxu0 %v206_v12 }
  0x61   : > { %447 = vmatprep.subr.mxu0 %v647_v0 }
  0x62   : > { %448 = vmatpush3.msra.mxu0 %v205_v13 }
  0x63   : > { %449 = vmatprep.subr.mxu0 %v647_v0 }
  0x64   : > { %450 = vmatpush3.msra.mxu0 %v204_v14 }
  0x65   : > { %451 = vmatprep.subr.mxu0 %v647_v0 }
  0x66   : > { %452 = vmatpush3.msra.mxu0 %v203_v15 }
  0x67   : > { %453 = vmatprep.subr.mxu0 %v647_v0 }
  0x68   : > { %454 = vmatpush3.msra.mxu0 %v202_v16 }
  0x69   : > { %456 = vmatmul.mubr.f32.vlgmr.msra.gmra.mxu0 %v201_v17 }
 0x129   : > { %v284_v19 = vpop.f32.mrf.mxu0 }
 0x12a   : > { %v295_v20 = vsub.f32 %v284_v19, %v401_v18 }
 0x12b   : > { %v457_v21 = vpop.f32.mrf.mxu0 }
 0x12c   : > { %296 = vst [vmem:[%s200_s22] sm:$0xff] %v295_v20 }
 0x12d   : > { %586 = shalt.err (!%p583_p0)
}
 0x12e   : > { %s587_s9 = scalar_lea.hbm %s803_s29, 128  ;;  %s591_s21 = scalar_lea.hbm %s843_s3, 256 }
 0x12f   : > { %p588_p5 = scmp.ne.s32.totalorder %s803_s29, %s587_s9  ;;  %p592_p1 = scmp.lt.s32.totalorder %s803_s29, %s843_s3 }
 0x130   : > { %p593_p4 = scmp.lt.s32.totalorder %s591_s21, %s587_s9 }
 0x131   : > { %p589_p9 = pnand %p588_p5, %p859_p3 }
 0x132   : > { %p594_p6 = por %p593_p4, %p592_p1 }
 0x133   : > { %p590_p12 = pneg %p589_p9 }
 0x135   : > { %p595_p8 = pnand %p594_p6, %p590_p12 }
 0x137   : > { %598 = shalt.err (!%p595_p8)
}
 0x138   : > { %464 = dma.vmem_to_hbm [thread:$0]  (%p859_p3), %s312_s23, 128, %s803_s29, %s298_s30  }
 0x139 PF: > { %s323_s18 = sand.u32 1, %s629_s12   ;;  %p860_p11 = scmp.ne.s32.totalorder %s849_s19, 0 }
 0x13a   : > { %p861_p7 = scmp.ge.s32.totalorder %s641_s15, 2  ;;  %s324_s20 = scalar_lea.sflag [#allocation4], %s323_s18 }
 0x13c   : > { %p475_p10 = pnand %p861_p7, %p860_p11 }
 0x13e   : > { %p476_p2 = pneg %p475_p10 }
 0x140   : > { %624 = dma.done.wait (%p476_p2), %s324_s20, 128  }
 0x141   : > { %626 = vsyncadd (%p476_p2), %s324_s20, 4294967168  ;;  %p17_p13 = scmp.ge.s32.totalorder %s724_s24, 4   ;;  %s862_s12 = smov %s633_s13 }
 0x142   : > { %s863_s13 = smov %s637_s14  ;;  %s864_s14 = smov %s741_s5 }
 0x143   : > { %s865_s15 = smov %s724_s24  ;;  %19 = sbr.rel (!%p17_p13) target bundleno = 6 (0x6), region = 81 }
 0x148   :  { %329 = vsyncpa [#allocation3], 1 }
 0x149   :  { %331 = vsyncpa [#allocation3 + $0x1], 1 }
 0x14a   :  { %332 = vsyncpa [#allocation6], 1 }
 0x14b   :  { %333 = vsyncpa [#allocation4], 1 }
 0x14c   :  { %335 = vsyncpa [#allocation4 + $0x1], 1 }

</bundles_post_ra>
